<compile_context>
chip_gen: v7x
topology: tpu7x:2x2x1
jax: 0.10.0
libtpu: 0.0.40
codegen_flags: <defaults>
</compile_context>

<pallas_src>
import functools
import math

import jax
import jax.numpy as jnp
from jax import lax
from jax.experimental import pallas as pl
from jax.experimental.pallas import tpu as pltpu

_TWO_PI = 2.0 * math.pi
_HALF_PI = math.pi / 2.0


def _cdiv(a, b):
    return -(-a // b)


def _round_up(v, m):
    return ((v + m - 1) // m) * m


def _pos_emb_kernel(x_ref, w_ref, o_ref, *, half):
    # x_ref: (TN, pack*D) native dtype
    # w_ref: (pack*D, pack*2H) f32, block-diagonal of [W.T | W.T]
    # o_ref: (TN, pack*2H)  -> one lane-dense store, no concat, one cos pass.
    x = x_ref[...].astype(jnp.float32)          # upcast in-kernel (no HBM copy)
    w = w_ref[...].astype(jnp.float32)
    f = _TWO_PI * jnp.dot(x, w, preferred_element_type=jnp.float32)  # MXU, f32
    lanes = o_ref.shape[-1]
    col = lax.broadcasted_iota(jnp.int32, (1, lanes), 1)
    # -pi/2 on every "sin" half of each 2H group: cos(t - pi/2) == sin(t).
    phase = jnp.where((col % (2 * half)) >= half,
                      jnp.float32(-_HALF_PI), jnp.float32(0.0))
    o_ref[...] = jnp.cos(f + phase).astype(o_ref.dtype)


def _reference(x, kernel):
    f = _TWO_PI * jnp.matmul(x.astype(jnp.float32), kernel.T.astype(jnp.float32))
    return jnp.concatenate([jnp.cos(f), jnp.sin(f)], axis=-1)


def learned_pos_emb(x, kernel, *, force_pallas=False, min_rows_for_pallas=1024):
    """x: (..., input_size).  kernel: (output_size//2, input_size)."""
    half, input_size = kernel.shape
    output_size = 2 * half
    lead_shape = x.shape[:-1]
    n = 1
    for d in lead_shape:
        n *= int(d)
    out_dtype = jnp.result_type(x.dtype, kernel.dtype)

    # Tiny inputs: a standalone pallas_call is overhead-dominated; let XLA fuse.
    if (n < min_rows_for_pallas and not force_pallas) or n == 0:
        return _reference(x, kernel).astype(out_dtype).reshape(
            *lead_shape, output_size)

    # ---- row packing so the stored last dim is a multiple of 128 lanes ----
    pack = 1
    if output_size % 128 != 0:
        cand = 128 // math.gcd(output_size, 128)
        if cand <= 16 and n % cand == 0:
            pack = cand
    n_p = n // pack
    d_p = pack * input_size
    lanes = pack * output_size            # multiple of 128 when pack > 1

    # Native-dtype activation, contiguous reshape only (no pad, no astype).
    xp = x.reshape(n_p, d_p)

    # Small block-diagonal weight built once from the (tiny) parameter:
    # each diagonal block is [W.T | W.T]; the kernel handles the sin phase.
    w_t = kernel.astype(jnp.float32).T                       # (D, H)
    base = jnp.concatenate([w_t, w_t], axis=1)               # (D, 2H)
    wbig = jnp.kron(jnp.eye(pack, dtype=jnp.float32), base) if pack > 1 else base

    # ---- tile sizing from lane-padded VMEM bytes (incl. f32 intermediates) --
    x_item = jnp.dtype(x.dtype).itemsize
    o_item = jnp.dtype(out_dtype).itemsize
    lanes_x = _round_up(d_p, 128)
    lanes_o = _round_up(lanes, 128)
    per_row = (2 * (lanes_x * x_item + lanes_o * o_item)      # dbl-buffered blocks
               + 4 * (lanes_x + 2 * lanes_o))                 # f32 x, f, cos(f)
    budget = 16 * 1024 * 1024                                 # safe on v7x 64 MiB
    tile = budget // per_row
    tile = min(tile, 8192)                                    # v7x-friendly cap
    tile = min(tile, _round_up(_cdiv(n_p, 8), 8))             # >= ~8 grid steps
    tile = min(tile, _round_up(n_p, 8))
    tile = max(8, (tile // 8) * 8)

    grid = (_cdiv(n_p, tile),)                                # ragged block masked

    # Resident weight counted double-buffered (constant index_map is never
    # re-fetched; pl.Buffered(1) could drop the second copy for huge weights).
    w_bytes = 2 * _round_up(d_p, 8) * lanes_o * 4
    needed = tile * per_row + w_bytes
    vmem_limit = int(min(32 * 1024 * 1024,
                         max(needed + 4 * 1024 * 1024, 8 * 1024 * 1024)))

    cost = pl.CostEstimate(
        flops=2 * n_p * d_p * lanes,
        transcendentals=n * output_size,                      # one cos per out elem
        bytes_accessed=(n_p * d_p * x_item + d_p * lanes * 4
                        + n_p * lanes * o_item),
    )

    out = pl.pallas_call(
        functools.partial(_pos_emb_kernel, half=half),
        out_shape=jax.ShapeDtypeStruct((n_p, lanes), out_dtype),
        grid=grid,
        in_specs=[
            pl.BlockSpec((tile, d_p), lambda i: (i, 0)),
            pl.BlockSpec((d_p, lanes), lambda i: (0, 0)),     # weight resident
        ],
        out_specs=pl.BlockSpec((tile, lanes), lambda i: (i, 0)),
        compiler_params=pltpu.CompilerParams(
            dimension_semantics=("parallel",),   # rows shard across v7x's 2 TCs
            vmem_limit_bytes=vmem_limit,
        ),
        cost_estimate=cost,
    )(xp, wbig)

    # (n_p, pack*2H) row-major == (n, 2H) row-major: free reshape back.
    return out.reshape(*lead_shape, output_size)


if __name__ == "__main__":
    # Shapes consistent with the module: batch=2, seq=8, input_size=16,
    # output_size=64 (kernel parameter is (32, 16)).
    input_size = 16
    output_size = 64

    key = jax.random.PRNGKey(0)
    k_x, k_w = jax.random.split(key)
    x = jax.random.normal(k_x, (2, 8, input_size), dtype=jnp.float32)
    # Deterministic init mirroring torch.randn(...) * 0.2
    kernel = 0.2 * jax.random.normal(
        k_w, (output_size // 2, input_size), dtype=jnp.float32
    )

    # force_pallas=True so the demo exercises the kernel (the size gate would
    # otherwise route this tiny problem to the fused XLA path).
    out = learned_pos_emb(x, kernel, force_pallas=True)
    out = jax.block_until_ready(out)

    # Pure-JAX reference check (cos(f - pi/2) == sin(f) up to a few ulps).
    ref = _reference(x, kernel)
    assert out.shape == (2, 8, output_size)
    assert jnp.allclose(out, ref, atol=5e-5, rtol=5e-5)

    print("KERNEL_OK")
</pallas_src>

<mosaic_0001>
module attributes {stable_mosaic.version = 11 : i64} {
  func.func @_pos_emb_kernel(%arg0: i32, %arg1: memref<8x32xf32, #tpu.memory_space<vmem>>, %arg2: memref<32x128xf32, #tpu.memory_space<vmem>>, %arg3: memref<8x128xf32, #tpu.memory_space<vmem>>) attributes {dimension_semantics = [#tpu.dimension_semantics<parallel>], iteration_bounds = array<i64: 1>, scalar_prefetch = 0 : i64, scratch_operands = 0 : i64, tpu.core_type = #tpu.core_type<tc>, window_params = [{transform_indices = @transform_0, window_bounds = array<i64: 8, 32>}, {pipeline_mode = #tpu.pipeline_mode<synchronous>, transform_indices = @transform_1, window_bounds = array<i64: 32, 128>}, {transform_indices = @transform_2, window_bounds = array<i64: 8, 128>}]} {
    %c0 = arith.constant 0 : index
    %c0_0 = arith.constant 0 : index
    %0 = vector.load %arg1[%c0, %c0_0] : memref<8x32xf32, #tpu.memory_space<vmem>>, vector<8x32xf32>
    %c0_1 = arith.constant 0 : index
    %c0_2 = arith.constant 0 : index
    %1 = vector.load %arg2[%c0_1, %c0_2] : memref<32x128xf32, #tpu.memory_space<vmem>>, vector<32x128xf32>
    %cst = arith.constant dense<0.000000e+00> : vector<8x128xf32>
    %2 = tpu.matmul %0, %1, %cst {dimension_numbers = #tpu.dot_dimension_numbers<[1], [0], [0], [1], [0, 0, 1, 1], [], []>} : vector<8x32xf32>, vector<32x128xf32>, vector<8x128xf32> -> vector<8x128xf32>
    %cst_3 = arith.constant 6.28318548 : f32
    %3 = vector.broadcast %cst_3 : f32 to vector<8x128xf32>
    %4 = arith.mulf %3, %2 : vector<8x128xf32>
    %5 = tpu.iota {dimensions = array<i32: 1>} : vector<1x128xi32>
    %c64_i32 = arith.constant 64 : i32
    %c0_i32 = arith.constant 0 : i32
    %6 = arith.cmpi eq, %c64_i32, %c0_i32 : i32
    %c1_i32 = arith.constant 1 : i32
    %7 = arith.select %6, %c1_i32, %c64_i32 : i32
    %8 = vector.broadcast %7 : i32 to vector<1x128xi32>
    %9 = arith.remsi %5, %8 : vector<1x128xi32>
    %c0_i32_4 = arith.constant 0 : i32
    %10 = vector.broadcast %c0_i32_4 : i32 to vector<1x128xi32>
    %11 = arith.cmpi ne, %9, %10 : vector<1x128xi32>
    %c0_i32_5 = arith.constant 0 : i32
    %12 = vector.broadcast %c0_i32_5 : i32 to vector<1x128xi32>
    %13 = arith.cmpi slt, %9, %12 : vector<1x128xi32>
    %c0_i32_6 = arith.constant 0 : i32
    %14 = arith.cmpi slt, %7, %c0_i32_6 : i32
    %15 = vector.broadcast %14 : i1 to vector<1x128xi1>
    %16 = vector.broadcast %15 : vector<1x128xi1> to vector<1x128xi1>
    %17 = arith.xori %13, %16 : vector<1x128xi1>
    %18 = arith.andi %17, %11 : vector<1x128xi1>
    %19 = vector.broadcast %7 : i32 to vector<1x128xi32>
    %20 = arith.addi %9, %19 : vector<1x128xi32>
    %21 = arith.select %18, %20, %9 : vector<1x128xi1>, vector<1x128xi32>
    %c32_i32 = arith.constant 32 : i32
    %22 = vector.broadcast %c32_i32 : i32 to vector<1x128xi32>
    %23 = arith.cmpi sge, %21, %22 : vector<1x128xi32>
    %cst_7 = arith.constant -1.57079637 : f32
    %cst_8 = arith.constant 0.000000e+00 : f32
    %24 = vector.broadcast %cst_7 : f32 to vector<1x128xf32>
    %25 = vector.broadcast %cst_8 : f32 to vector<1x128xf32>
    %26 = arith.select %23, %24, %25 : vector<1x128xi1>, vector<1x128xf32>
    %27 = vector.broadcast %26 : vector<1x128xf32> to vector<8x128xf32>
    %28 = arith.addf %4, %27 : vector<8x128xf32>
    %29 = math.cos %28 : vector<8x128xf32>
    %c0_9 = arith.constant 0 : index
    %c0_10 = arith.constant 0 : index
    %30 = vector.load %arg3[%c0_9, %c0_10] : memref<8x128xf32, #tpu.memory_space<vmem>>, vector<8x128xf32>
    tpu.vector_store %arg3[%c0_9, %c0_10], %29 {strides = array<i32>} : memref<8x128xf32, #tpu.memory_space<vmem>>, vector<8x128xf32>,
    return
  }
  func.func @transform_0(%arg0: i32) -> (i32, i32) {
    %c0_i32 = arith.constant 0 : i32
    %c0_i32_0 = arith.constant 0 : i32
    return %arg0, %c0_i32 : i32, i32
  }
  func.func @transform_1(%arg0: i32) -> (i32, i32) {
    %c0_i32 = arith.constant 0 : i32
    %c0_i32_0 = arith.constant 0 : i32
    %c0_i32_1 = arith.constant 0 : i32
    return %c0_i32, %c0_i32_0 : i32, i32
  }
  func.func @transform_2(%arg0: i32) -> (i32, i32) {
    %c0_i32 = arith.constant 0 : i32
    %c0_i32_0 = arith.constant 0 : i32
    return %arg0, %c0_i32 : i32, i32
  }
}

</mosaic_0001>

<bundles_post_ra>
// kernel: tpu_custom_call.1
= control target key start
LH: loop header
LB: loop body
LE: loop exit
PB: predicated region body
PF: predicated region fallthrough
CT: control target
= control target key end

     0   :  { %7 = vsyncpa [#allocation3], 0  ;;  %s469_s0 = inlined_call_operand.hbm [shape: f32[8,32], index: 0, kind: input, shape index: {}]   ;;  %s470_s1 = inlined_call_operand.hbm [shape: f32[32,128], index: 1, kind: input, shape index: {}]   ;;  %s471_s2 = inlined_call_operand.hbm [shape: f32[8,128], index: 2, kind: output, shape index: {}]  }
   0x1   :  { %8 = vsyncpa [#allocation6], 0 }
   0x2   :  { %9 = vsyncpa [#allocation4], 0  ;;  %s376_s9 = smov [#allocation2]   ;;  %s377_s11 = smov [#allocation5]  }
   0x3   :  { %s16_s10 = sshll.u32 %s376_s9, 4  ;;  %s25_s12 = sshll.u32 %s377_s11, 4  ;;  %s17_s10 = int_to_ptr.vmem [resolvable:$true] %s16_s10  ;;  %s405_s12 = int_to_ptr.vmem [resolvable:$true] %s25_s12 }
   0x4   :  { %s304_s15 = scalar_lea.hbm %s469_s0, 128 }
   0x5   :  { %p305_p0 = scmp.ne.s32.totalorder %s469_s0, %s304_s15  ;;  %p308_p1 = scmp.lt.u32.totalorder %s304_s15, %s469_s0 }
   0x7   :  { %p310_p2 = pnand %p308_p1, %p305_p0 }
   0x9   :  { %313 = shalt.err (!%p310_p2)
}
   0xa   :  { %s314_s20 = scalar_lea.vmem %s17_s10, 128  ;;  %p319_p4 = scmp.lt.s32.totalorder %s17_s10, %s17_s10 }
   0xb   :  { %p315_p3 = scmp.ne.s32.totalorder %s17_s10, %s314_s20  ;;  %p320_p5 = scmp.lt.s32.totalorder %s314_s20, %s314_s20 }
   0xd   :  { %p321_p6 = por %p320_p5, %p319_p4 }
   0xf   :  { %p322_p7 = pnand %p321_p6, %p315_p3 }
  0x11   :  { %325 = shalt.err (!%p322_p7)
}
  0x12   :  { %19 = dma.hbm_to_vmem [thread:$0]  %s469_s0, 128, %s17_s10, [#allocation3]  }
  0x13   :  { %s326_s25 = scalar_lea.hbm %s470_s1, 512 }
  0x14   :  { %p327_p8 = scmp.ne.s32.totalorder %s470_s1, %s326_s25  ;;  %p330_p9 = scmp.lt.u32.totalorder %s326_s25, %s470_s1 }
  0x16   :  { %p332_p10 = pnand %p330_p9, %p327_p8 }
  0x18   :  { %335 = shalt.err (!%p332_p10)
}
  0x19   :  { %s336_s30 = scalar_lea.vmem %s405_s12, 512  ;;  %p341_p12 = scmp.lt.s32.totalorder %s405_s12, %s405_s12 }
  0x1a   :  { %p337_p11 = scmp.ne.s32.totalorder %s405_s12, %s336_s30  ;;  %p342_p13 = scmp.lt.s32.totalorder %s336_s30, %s336_s30 }
  0x1c   :  { %p343_p0 = por %p342_p13, %p341_p12 }
  0x1e   :  { %p344_p1 = pnand %p343_p0, %p337_p11 }
  0x20   :  { %347 = shalt.err (!%p344_p1)
}
  0x21   :  { %s378_s0 = smov 128   ;;  %s379_s3 = smov 8  }
  0x22   :  { %31 = dma.hbm_to_vmem [thread:$0]  %s470_s1, 512, %s405_s12, [#allocation6], %s378_s0, %s378_s0, %s379_s3  }
  0x23   :  { %370 = dma.done.wait [#allocation3], 128  }
  0x24   :  { %371 = vsyncadd [#allocation3], 4294967168 }
  0x25   :  { %372 = dma.done.wait [#allocation6], 512  }
  0x26   :  { %373 = vsyncadd [#allocation6], 4294966784  ;;  %v380_v0 = vmov 0.0|0.0   ;;  %vm381_vm0 = vmmov 0   ;;  %v382_v1 = vmov 0.0   ;;  %v39_v2 = vld [vmem:[#allocation5] sm:$0xff]  ;;  %v118_v9 = vlaneseq }
  0x27   :  { %276 = vmatprep.subr.bf16.mxu0 %v380_v0  ;;  %273 = vmatprep.mubr.msk.f32.mxu0 %vm381_vm0, %v382_v1  ;;  %v40_v3 = vld [vmem:[#allocation5 + $0x8] sm:$0xff]  ;;  %v41_v4 = vld [vmem:[#allocation5 + $0x10] sm:$0xff]  ;;  %v42_v6 = vld [vmem:[#allocation5 + $0x18] sm:$0xff]  ;;  %vm43_vm1 = vcmask 261120   ;;  %v383_v28 = vmov 2102212464  }
  0x28   :  { %v277_v5 = vpack.c.bf16 %v40_v3, %v39_v2  ;;  %v280_v7 = vpack.c.bf16 %v42_v6, %v41_v4  ;;  %v38_v8 = vld [vmem:[#allocation2] sm:$0xff]  ;;  %v119_v10 = vand.u32 127, %v118_v9  ;;  %v384_v30 = vmov 920167782   ;;  %s389_s1 = smov [#allocation7]  }
  0x29   :  { %v385_v34 = vmov 1326507024   ;;  %v386_v36 = vmov 683565275   ;;  %v387_v38 = vmov 2475754826  }
  0x2a   :  { %278 = vmatpush3.bf16.msra.mxu0 %v277_v5  ;;  %v124_v11 = vand.u32 63, %v119_v10  ;;  %v388_v41 = vmov 2131351028   ;;  %s245_s6 = sshll.u32 %s389_s1, 4  ;;  %s246_s6 = int_to_ptr.vmem [resolvable:$true] %s245_s6 }
  0x2b   :  { %279 = vmatprep.subr.bf16.mxu0 %v380_v0  ;;  %s348_s7 = scalar_lea.vmem %s246_s6, 128  ;;  %p353_p3 = scmp.lt.s32.totalorder %s246_s6, %s246_s6 }
  0x2c   :  { %vm132_vm2 = vcmp.ge.s32.totalorder %v124_v11, 32  ;;  %p349_p2 = scmp.ne.s32.totalorder %s246_s6, %s348_s7  ;;  %p354_p4 = scmp.lt.s32.totalorder %s348_s7, %s348_s7 }
  0x2d   :  { %v133_v12 = vsel %vm132_vm2, -1.5707964, %v382_v1 }
  0x2e   :  { %281 = vmatpush3.bf16.msra.mxu0 %v280_v7  ;;  %p355_p5 = por %p354_p4, %p353_p3 }
  0x30   :  { %p356_p6 = pnand %p355_p5, %p349_p2 }
  0x31   :  { %274 = vmatmul.mubr.msk.f32.vlgmr.msra.gmra.mrb[0].mxu0 %vm43_vm1, %v38_v8 }
 0x104   :  { %v113_v13 = vpop.f32.mrb[0].mxu0 }
 0x105   :  { %v117_v14 = vmul.f32 6.2831855, %v113_v13  ;;  %v275_v15 = vpop.f32.mrb[1].mxu0 }
 0x107   :  { %v436_v16 = vadd.f32 %v133_v12, %v117_v14 }
 0x109   :  { %v138_v17 = vand.u32 2139095040, %v436_v16  ;;  %v135_v18 = vand.u32 2147483647, %v436_v16  ;;  %vm137_vm10 = vcmp.lt.s32.totalorder %v436_v16, 0  ;;  %vm227_vm15 = vweird.f32 %v436_v16 }
 0x10b   :  { %v139_v19 = vshrl.u32 %v138_v17, 23  ;;  %v142_v21 = vand.u32 8388607, %v135_v18  ;;  %vm136_vm11 = vcmp.le.f32.partialorder %v135_v18, 0.7853982 }
 0x10d   :  { %v256_v20 = vadd.s32 4294967169, %v139_v19  ;;  %v143_v24 = vor.u32 8388608, %v142_v21 }
 0x10f   :  { %v145_v22 = vadd.s32 1, %v256_v20  ;;  %v183_v32 = vshll.u32 %v143_v24, 8 }
 0x111   :  { %vm146_vm3 = vcmp.gt.s32.totalorder %v145_v22, 0 }
 0x112   :  { %v147_v23 = vsel %vm146_vm3, %v145_v22, 0 }
 0x113   :  { %v149_v25 = vand.u32 31, %v147_v23  ;;  %v148_v26 = vshrl.u32 %v147_v23, 5 }
 0x115   :  { %v150_v27 = vsub.s32 32, %v149_v25  ;;  %v161_v29 = vshll.u32 %v383_v28, %v149_v25  ;;  %v164_v31 = vshll.u32 %v384_v30, %v149_v25  ;;  %v152_v37 = vshll.u32 %v386_v36, %v149_v25 }
 0x116   :  { %v155_v40 = vshll.u32 %v387_v38, %v149_v25  ;;  %v158_v43 = vshll.u32 %v388_v41, %v149_v25  ;;  %vm170_vm4 = vcmp.lt.s32.totalorder %v148_v26, 4  ;;  %vm167_vm5 = vcmp.lt.s32.totalorder %v148_v26, 1 }
 0x117   :  { %v162_v33 = vshrl.u32 %v384_v30, %v150_v27  ;;  %v165_v35 = vshrl.u32 %v385_v34, %v150_v27  ;;  %v153_v39 = vshrl.u32 %v387_v38, %v150_v27  ;;  %v156_v42 = vshrl.u32 %v388_v41, %v150_v27 }
 0x118   :  { %v159_v44 = vshrl.u32 %v383_v28, %v150_v27  ;;  %v151_v48 = vshrl.u32 %v386_v36, %v150_v27  ;;  %vm168_vm6 = vcmp.lt.s32.totalorder %v148_v26, 2  ;;  %vm169_vm7 = vcmp.lt.s32.totalorder %v148_v26, 3 }
 0x119   :  { %v163_v45 = vor.u32 %v162_v33, %v161_v29  ;;  %v166_v46 = vor.u32 %v165_v35, %v164_v31  ;;  %v154_v47 = vor.u32 %v153_v39, %v152_v37  ;;  %v157_v49 = vor.u32 %v156_v42, %v155_v40 }
 0x11a   :  { %v160_v50 = vor.u32 %v159_v44, %v158_v43 }
 0x11b   :  { %v176_v51 = vsel %vm170_vm4, %v163_v45, 920167782  ;;  %v180_v52 = vsel %vm170_vm4, %v166_v46, 1326507024  ;;  %v175_v54 = vsel %vm167_vm5, %v154_v47, %v157_v49  ;;  %v171_v57 = vsel %vm167_vm5, %v151_v48, %v154_v47 }
 0x11c   :  { %v172_v53 = vsel %vm170_vm4, %v160_v50, 2102212464  ;;  %v177_v55 = vsel %vm169_vm7, %v160_v50, %v176_v51  ;;  %v179_v56 = vsel %vm167_vm5, %v157_v49, %v160_v50  ;;  %v181_v60 = vsel %vm169_vm7, %v163_v45, %v180_v52 }
 0x11d   :  { %v173_v58 = vsel %vm169_vm7, %v157_v49, %v172_v53  ;;  %v178_v59 = vsel %vm168_vm6, %v175_v54, %v177_v55  ;;  %v182_v61 = vsel %vm168_vm6, %v179_v56, %v181_v60 }
 0x11e   :  { %v442_v62 = vmul.u32.u64.low %v183_v32, %v178_v59  ;;  %v443_v63 = vmul.u32.u64.high %v183_v32, %v178_v59, %v442_v62  ;;  %v445_v0 = vmul.u32.u64.low %v183_v32, %v182_v61  ;;  %v446_v1 = vmul.u32.u64.high %v183_v32, %v182_v61, %v445_v0 }
 0x11f   :  { %v174_v2 = vsel %vm168_vm6, %v171_v57, %v173_v58 }
 0x120   :  { %v193_v3 = vadd.s32 1, %v443_v63  ;;  %v190_v4 = vmul.u32 %v183_v32, %v174_v2  ;;  %vm192_vm8 = vc.u32 %v446_v1, %v442_v62  ;;  %v191_v17 = vadd.s32 %v442_v62, %v446_v1 }
 0x122   :  { %v194_v5 = vsel %vm192_vm8, %v193_v3, %v443_v63 }
 0x123   :  { %v195_v6 = vadd.s32 %v194_v5, %v190_v4 }
 0x125   :  { %v196_v7 = vadd.s32 536870912, %v195_v6 }
 0x127   :  { %v197_v8 = vshrl.u32 %v196_v7, 30 }
 0x129   :  { %v198_v9 = vshll.u32 %v197_v8, 30  ;;  %v221_v32 = vsub.s32 4, %v197_v8 }
 0x12b   :  { %v199_v10 = vsub.s32 %v195_v6, %v198_v9  ;;  %v222_v34 = vsel %vm137_vm10, %v221_v32, %v197_v8 }
 0x12c   :  { %v224_v35 = vsel %vm136_vm11, 0, %v222_v34 }
 0x12d   :  { %v201_v11 = vsub.s32 0, %v199_v10  ;;  %v228_v36 = vand.u32 3, %v224_v35 }
 0x12f   :  { %v257_v12 = vmin.u32 %v201_v11, %v199_v10  ;;  %vm233_vm12 = vcmp.eq.s32.totalorder %v228_v36, 2  ;;  %vm230_vm13 = vcmp.eq.s32.totalorder %v228_v36, 0  ;;  %vm229_vm14 = vcmp.lt.s32.totalorder %v228_v36, 2 }
 0x131   :  { %v203_v13 = vclz %v257_v12 }
 0x133   :  { %v258_v14 = vadd.s32 4294967294, %v203_v13 }
 0x135   :  { %vm259_vm9 = vcmp.lt.s32.totalorder %v258_v14, 0 }
 0x136   :  { %v206_v15 = vsel %vm259_vm9, 0, %v258_v14 }
 0x137   :  { %v207_v19 = vsub.s32 32, %v206_v15  ;;  %v211_v20 = vsub.s32 4294967266, %v206_v15  ;;  %v208_v21 = vshll.u32 %v199_v10, %v206_v15 }
 0x139   :  { %v209_v22 = vshrl.u32 %v191_v17, %v207_v19  ;;  %v212_v23 = vadd.s32 127, %v211_v20 }
 0x13b   :  { %v210_v24 = vor.u32 %v209_v22, %v208_v21  ;;  %v213_v25 = vshll.u32 %v212_v23, 23 }
 0x13d   :  { %v214_v26 = vor.u32 4788187, %v213_v25  ;;  %v217_v28 = vcvt.s32.f32 %v210_v24 }
 0x13f   :  { %v215_v27 = vand.u32 2147483647, %v214_v26 }
 0x141   :  { %v218_v29 = vmul.f32 %v217_v28, %v215_v27 }
 0x143   :  { %v219_v30 = vxor.u32 2147483648, %v218_v29 }
 0x145   :  { %v220_v31 = vsel %vm137_vm10, %v219_v30, %v218_v29 }
 0x146   :  { %v223_v33 = vsel %vm136_vm11, %v436_v16, %v220_v31 }
 0x147   :  { %300 = vcosq.f32 %v223_v33 }
 0x148   :  { %302 = vsinq.f32 %v223_v33 }
 0x151   :  { %v301_v37 = vpop.eup %300 }
 0x152   :  { %v303_v38 = vpop.eup %302  ;;  %v234_v39 = vxor.u32 2147483648, %v301_v37 }
 0x153   :  { %v231_v40 = vxor.u32 2147483648, %v303_v38 }
 0x154   :  { %v235_v41 = vsel %vm233_vm12, %v234_v39, %v303_v38 }
 0x155   :  { %v232_v18 = vsel %vm230_vm13, %v301_v37, %v231_v40 }
 0x156   :  { %v236_v42 = vsel %vm229_vm14, %v232_v18, %v235_v41 }
 0x157   :  { %v237_v43 = vsel %vm227_vm15, nan, %v236_v42 }
 0x158   :  { %238 = vst [vmem:[#allocation7] sm:$0xff] %v237_v43 }
 0x159   :  { %359 = shalt.err (!%p356_p6)
}
 0x15a   :  { %s360_s10 = scalar_lea.hbm %s471_s2, 128 }
 0x15b   :  { %p361_p7 = scmp.ne.s32.totalorder %s471_s2, %s360_s10  ;;  %p364_p8 = scmp.lt.u32.totalorder %s360_s10, %s471_s2 }
 0x15d   :  { %p366_p9 = pnand %p364_p8, %p361_p7 }
 0x15f   :  { %369 = shalt.err (!%p366_p9)
}
 0x160   :  { %248 = dma.vmem_to_hbm [thread:$0]  %s246_s6, 128, %s471_s2, [#allocation4]  }
 0x161   :  { %374 = dma.done.wait [#allocation4], 128  }
 0x162   :  { %375 = vsyncadd [#allocation4], 4294967168 }
 0x163   :  { %252 = vsyncpa [#allocation3], 1 }
 0x164   :  { %253 = vsyncpa [#allocation6], 1 }
 0x165   :  { %254 = vsyncpa [#allocation4], 1 }

</bundles_post_ra>
